<compile_context>
chip_gen: v7x
topology: tpu7x:2x2x1
jax: 0.10.0
libtpu: 0.0.40
codegen_flags: <defaults>
</compile_context>

<pallas_src>
import math

import jax
import jax.numpy as jnp
from jax.experimental import pallas as pl
from jax.experimental.pallas import tpu as pltpu


def _combined_emb_kernel(t_ref, labels_ref,               # (bn,1) VMEM, (Np,) SMEM
                         w1_ref, b1_ref, w2_ref, b2_ref,  # VMEM (bf16 / f32)
                         table_ref,                        # HBM (pl.ANY)
                         out_ref,                          # (bn, D) VMEM
                         cls_buf, gsem,                    # scratch VMEM + DMA sem
                         *, max_period=10000.0):
    bn, d = out_ref.shape
    half = w1_ref.shape[0] // 2
    c1 = table_ref.shape[0]
    base = pl.program_id(0) * bn

    # --- 1. Kick off the class-embedding row gather (HBM -> VMEM): one small
    # row DMA per batch element, addressed from the SMEM labels, overlapped
    # with the timestep MLP below.
    @pl.loop(0, bn)
    def _start_gather(r):
        lbl = jnp.clip(labels_ref[base + r], 0, c1 - 1)   # clamp OOB labels
        pltpu.make_async_copy(table_ref.at[pl.ds(lbl, 1)],
                              cls_buf.at[pl.ds(r, 1)], gsem).start()

    # --- 2. Sinusoidal timestep embedding; frequencies computed on the EUP.
    # exponent = -log(max_period) * k / (half - downscale_freq_shift), shift=1.
    t_col = t_ref[...]                                     # (bn, 1) f32
    k = jax.lax.broadcasted_iota(jnp.int32, (1, half), 1).astype(jnp.float32)
    freqs = jnp.exp(k * (-math.log(max_period) / (half - 1.0)))   # (1, half)
    arg = t_col * freqs                                    # (bn, half) f32
    # flip_sin_to_cos=True => proj = [cos | sin]; concat is lane-tile aligned
    # (half == 128), so the first matmul is a single K=256 MXU pass.
    proj = jnp.concatenate([jnp.cos(arg), jnp.sin(arg)], axis=-1)

    # --- 3. TimestepEmbedding MLP: operands in the weight dtype (bf16),
    # f32 accumulation, f32 biases and elementwise math.
    h = jnp.dot(proj.astype(w1_ref.dtype), w1_ref[...],
                preferred_element_type=jnp.float32) + b1_ref[...]
    h = h * jax.nn.sigmoid(h)                              # SiLU
    t_emb = jnp.dot(h.astype(w2_ref.dtype), w2_ref[...],
                    preferred_element_type=jnp.float32) + b2_ref[...]

    # --- 4. Wait for the gathered class rows and combine.
    @pl.loop(0, bn)
    def _wait_gather(r):
        pltpu.make_async_copy(table_ref.at[pl.ds(0, 1)],
                              cls_buf.at[pl.ds(r, 1)], gsem).wait()
    out_ref[...] = (t_emb + cls_buf[...].astype(jnp.float32)).astype(out_ref.dtype)


def combined_timestep_label_embeddings(timestep, class_labels, params, *,
                                       batch_block=128, out_dtype=jnp.float32):
    """timestep: (N,) float; class_labels: (N,) int. Returns (N, D)."""
    w1, b1, w2, b2, table = (params["w1"], params["b1"], params["w2"],
                             params["b2"], params["table"])
    n = timestep.shape[0]
    in_ch, d = w1.shape          # (256, D)
    c1 = table.shape[0]          # num_classes + 1 (CFG row)
    assert batch_block % 8 == 0

    # Batch tiling only when the (bn, D) output block satisfies the (8, 128)
    # rule; otherwise run the whole batch as one block.
    bn = batch_block if (n > batch_block and d % 128 == 0) else n
    grid_n = pl.cdiv(n, bn)
    n_pad = grid_n * bn

    t_in = timestep.astype(jnp.float32).reshape(n, 1)
    l_in = class_labels.astype(jnp.int32).reshape(n)
    if n_pad != n:               # pad the tiny 1-D inputs: no partial blocks ever
        t_in = jnp.pad(t_in, ((0, n_pad - n), (0, 0)))
        l_in = jnp.pad(l_in, (0, n_pad - n))
    b1_2 = b1.astype(jnp.float32).reshape(1, d)
    b2_2 = b2.astype(jnp.float32).reshape(1, d)

    def const(shape):            # weights / biases: constant block index
        return pl.BlockSpec(shape, lambda i: (0, 0))

    isz = lambda a: jnp.dtype(a.dtype).itemsize
    # VMEM residency: weights/biases (+ default double buffering) + per-block
    # I/O + gather scratch, plus headroom; capped below v7x's 64 MiB.
    w_bytes = int(w1.size * isz(w1) + w2.size * isz(w2) + 2 * 4 * d)
    blk_bytes = int(2 * (bn * d * jnp.dtype(out_dtype).itemsize + bn * 4)
                    + bn * d * isz(table))
    vmem_limit = int(min(2 * (w_bytes + blk_bytes) + (16 << 20), 48 << 20))

    cost = pl.CostEstimate(
        flops=int(2 * n * (in_ch * d + d * d) + 8 * n * d),
        transcendentals=int(n * (in_ch + d)),
        bytes_accessed=int(w_bytes + n * d * isz(table)
                           + n * d * jnp.dtype(out_dtype).itemsize + 8 * n),
    )

    out = pl.pallas_call(
        _combined_emb_kernel,
        out_shape=jax.ShapeDtypeStruct((n_pad, d), out_dtype),
        grid=(grid_n,),
        in_specs=[
            pl.BlockSpec((bn, 1), lambda i: (i, 0)),            # timestep column
            pl.BlockSpec(memory_space=pltpu.MemorySpace.SMEM),  # labels (scalars)
            const((in_ch, d)),                                  # w1  (bf16)
            const((1, d)),                                      # b1  (f32)
            const((d, d)),                                      # w2  (bf16)
            const((1, d)),                                      # b2  (f32)
            pl.BlockSpec(memory_space=pl.ANY),                  # table (HBM)
        ],
        out_specs=pl.BlockSpec((bn, d), lambda i: (i, 0)),
        scratch_shapes=[
            pltpu.VMEM((bn, d), table.dtype),   # gathered class-embedding rows
            pltpu.SemaphoreType.DMA,            # shared gather semaphore
        ],
        compiler_params=pltpu.CompilerParams(
            # Single batch axis kept "arbitrary": megacore-splitting it on v7x
            # would duplicate the dominant w1/w2 HBM streaming per TensorCore.
            dimension_semantics=("arbitrary",),
            vmem_limit_bytes=vmem_limit),
        cost_estimate=cost,
    )(t_in, l_in, w1, b1_2, w2, b2_2, table)

    return out[:n] if n_pad != n else out


def _reference(timestep, class_labels, params):
    """Pure-JAX reference matching the PyTorch module (f32 math)."""
    w1 = params["w1"].astype(jnp.float32)
    b1 = params["b1"].astype(jnp.float32)
    w2 = params["w2"].astype(jnp.float32)
    b2 = params["b2"].astype(jnp.float32)
    table = params["table"].astype(jnp.float32)
    in_ch = w1.shape[0]
    half = in_ch // 2
    k = jnp.arange(half, dtype=jnp.float32)
    freqs = jnp.exp(-math.log(10000.0) * k / (half - 1.0))
    arg = timestep.astype(jnp.float32)[:, None] * freqs[None, :]
    emb = jnp.concatenate([jnp.sin(arg), jnp.cos(arg)], axis=-1)
    proj = jnp.concatenate([emb[:, half:], emb[:, :half]], axis=-1)  # flip
    h = proj @ w1 + b1
    h = h * jax.nn.sigmoid(h)
    t_emb = h @ w2 + b2
    return t_emb + table[class_labels]


if __name__ == "__main__":
    IN_CH = 256             # Timesteps num_channels (fixed by the module)
    D = 128                 # embedding_dim
    NUM_CLASSES = 10
    C1 = NUM_CLASSES + 1    # +1 CFG row (class_dropout_prob=0.1 > 0)

    key = jax.random.PRNGKey(0)
    _, k_w1, k_b1, k_w2, k_b2, k_tab = jax.random.split(key, 6)

    # bf16 matmul weights (they stream from HBM every call), f32 biases; the
    # embedding table is f32 since only the gathered rows are ever read.
    params = {
        "w1": (jax.random.normal(k_w1, (IN_CH, D), jnp.float32) * 0.02
               ).astype(jnp.bfloat16),
        "b1": jax.random.normal(k_b1, (D,), jnp.float32) * 0.02,
        "w2": (jax.random.normal(k_w2, (D, D), jnp.float32) * 0.02
               ).astype(jnp.bfloat16),
        "b2": jax.random.normal(k_b2, (D,), jnp.float32) * 0.02,
        "table": jax.random.normal(k_tab, (C1, D), jnp.float32) * 0.02,
    }

    def run_case(n, batch_block):
        kt, kl = jax.random.split(jax.random.fold_in(key, n))
        timestep = jax.random.uniform(kt, (n,), jnp.float32) * 1000.0
        labels = jax.random.randint(kl, (n,), 0, NUM_CLASSES, dtype=jnp.int32)
        out = combined_timestep_label_embeddings(
            timestep, labels, params, batch_block=batch_block)
        out = jax.block_until_ready(out)
        ref = _reference(timestep, labels, params)
        assert out.shape == (n, D) and out.dtype == jnp.float32
        # bf16 matmul operands + TPU EUP transcendentals vs. host f32 reference.
        assert jnp.allclose(out, ref, atol=5e-3, rtol=5e-3), \
            f"mismatch vs reference (n={n})"

    run_case(8, 128)    # single full block (bn = N)
    run_case(12, 8)     # grid of 2 with N % batch_block != 0 (padded tail)
    print("KERNEL_OK")
</pallas_src>

<mosaic_0001>
module attributes {stable_mosaic.version = 11 : i64} {
  func.func @_combined_emb_kernel(%arg0: i32, %arg1: memref<8x1xf32, #tpu.memory_space<vmem>>, %arg2: memref<8xi32, #tpu.memory_space<smem>>, %arg3: memref<256x128xbf16, #tpu.memory_space<vmem>>, %arg4: memref<1x128xf32, #tpu.memory_space<vmem>>, %arg5: memref<128x128xbf16, #tpu.memory_space<vmem>>, %arg6: memref<1x128xf32, #tpu.memory_space<vmem>>, %arg7: memref<11x128xf32, #tpu.memory_space<any>>, %arg8: memref<8x128xf32, #tpu.memory_space<vmem>>, %arg9: memref<8x128xf32, #tpu.memory_space<vmem>>, %arg10: memref<!tpu.dma_semaphore, #tpu.memory_space<semaphore_mem>>) attributes {dimension_semantics = [#tpu.dimension_semantics<arbitrary>], iteration_bounds = array<i64: 1>, scalar_prefetch = 0 : i64, scratch_operands = 2 : i64, tpu.core_type = #tpu.core_type<tc>, window_params = [{transform_indices = @transform_0, window_bounds = array<i64: 8, 1>}, {transform_indices = @transform_1, window_bounds = array<i64: 8>}, {pipeline_mode = #tpu.pipeline_mode<synchronous>, transform_indices = @transform_2, window_bounds = array<i64: 256, 128>}, {pipeline_mode = #tpu.pipeline_mode<synchronous>, transform_indices = @transform_3, window_bounds = array<i64: 1, 128>}, {pipeline_mode = #tpu.pipeline_mode<synchronous>, transform_indices = @transform_4, window_bounds = array<i64: 128, 128>}, {pipeline_mode = #tpu.pipeline_mode<synchronous>, transform_indices = @transform_5, window_bounds = array<i64: 1, 128>}, {}, {transform_indices = @transform_7, window_bounds = array<i64: 8, 128>}]} {
    %c8_i32 = arith.constant 8 : i32
    %0 = arith.muli %arg0, %c8_i32 : i32
    %c0_i32 = arith.constant 0 : i32
    %c8_i32_0 = arith.constant 8 : i32
    %1 = arith.addi %c0_i32, %c8_i32_0 : i32
    %c1_i32 = arith.constant 1 : i32
    scf.for %arg11 = %c0_i32 to %1 step %c1_i32  : i32 {
      %c1_i32_22 = arith.constant 1 : i32
      %36 = arith.muli %arg11, %c1_i32_22 : i32
      %c0_i32_23 = arith.constant 0 : i32
      %37 = arith.addi %c0_i32_23, %36 : i32
      %38 = arith.addi %0, %37 : i32
      %39 = arith.index_cast %38 : i32 to index
      %40 = memref.load %arg2[%39] : memref<8xi32, #tpu.memory_space<smem>>
      %c0_i32_24 = arith.constant 0 : i32
      %c10_i32 = arith.constant 10 : i32
      %41 = arith.maxsi %c0_i32_24, %40 : i32
      %42 = arith.minsi %c10_i32, %41 : i32
      %c0_i32_25 = arith.constant 0 : i32
      %43 = tpu.memref_slice %arg7[%42, %c0_i32_25] : memref<11x128xf32, #tpu.memory_space<any>> -> memref<1x128xf32, #tpu.memory_space<any>>
      %c0_i32_26 = arith.constant 0 : i32
      %44 = tpu.memref_slice %arg9[%37, %c0_i32_26] : memref<8x128xf32, #tpu.memory_space<vmem>> -> memref<1x128xf32, #tpu.memory_space<vmem>>
      tpu.enqueue_dma source(%43 : memref<1x128xf32, #tpu.memory_space<any>>) target(%44 : memref<1x128xf32, #tpu.memory_space<vmem>>) target_semaphore(%arg10 : memref<!tpu.dma_semaphore, #tpu.memory_space<semaphore_mem>>)
    }
    %c8_i32_1 = arith.constant 8 : i32
    %c0 = arith.constant 0 : index
    %c0_2 = arith.constant 0 : index
    %2 = vector.load %arg1[%c0, %c0_2] : memref<8x1xf32, #tpu.memory_space<vmem>>, vector<8x1xf32>
    %3 = tpu.iota {dimensions = array<i32: 1>} : vector<1x128xi32>
    %4 = arith.sitofp %3 : vector<1x128xi32> to vector<1x128xf32>
    %cst = arith.constant -0.0725223646 : f32
    %5 = vector.broadcast %cst : f32 to vector<1x128xf32>
    %6 = arith.mulf %4, %5 : vector<1x128xf32>
    %7 = math.exp %6 : vector<1x128xf32>
    %8 = vector.broadcast %2 : vector<8x1xf32> to vector<8x128xf32>
    %9 = vector.broadcast %7 : vector<1x128xf32> to vector<8x128xf32>
    %10 = arith.mulf %8, %9 : vector<8x128xf32>
    %11 = math.cos %10 : vector<8x128xf32>
    %12 = math.sin %10 : vector<8x128xf32>
    %13 = tpu.concatenate %11, %12 in 1 : vector<8x128xf32>, vector<8x128xf32> -> vector<8x256xf32>
    %14 = arith.truncf %13 : vector<8x256xf32> to vector<8x256xbf16>
    %c0_3 = arith.constant 0 : index
    %c0_4 = arith.constant 0 : index
    %15 = vector.load %arg3[%c0_3, %c0_4] : memref<256x128xbf16, #tpu.memory_space<vmem>>, vector<256x128xbf16>
    %cst_5 = arith.constant dense<0.000000e+00> : vector<8x128xf32>
    %16 = tpu.matmul %14, %15, %cst_5 {dimension_numbers = #tpu.dot_dimension_numbers<[1], [0], [0], [1], [0, 0, 1, 1], [], []>} : vector<8x256xbf16>, vector<256x128xbf16>, vector<8x128xf32> -> vector<8x128xf32>
    %c0_6 = arith.constant 0 : index
    %c0_7 = arith.constant 0 : index
    %17 = vector.load %arg4[%c0_6, %c0_7] : memref<1x128xf32, #tpu.memory_space<vmem>>, vector<1x128xf32>
    %18 = vector.broadcast %17 : vector<1x128xf32> to vector<8x128xf32>
    %19 = arith.addf %16, %18 : vector<8x128xf32>
    %20 = arith.negf %19 : vector<8x128xf32>
    %21 = math.exp %20 : vector<8x128xf32>
    %cst_8 = arith.constant 1.000000e+00 : f32
    %22 = vector.broadcast %cst_8 : f32 to vector<8x128xf32>
    %23 = arith.addf %22, %21 : vector<8x128xf32>
    %24 = arith.divf %22, %23 : vector<8x128xf32>
    %25 = arith.mulf %19, %24 : vector<8x128xf32>
    %26 = arith.truncf %25 : vector<8x128xf32> to vector<8x128xbf16>
    %c0_9 = arith.constant 0 : index
    %c0_10 = arith.constant 0 : index
    %27 = vector.load %arg5[%c0_9, %c0_10] : memref<128x128xbf16, #tpu.memory_space<vmem>>, vector<128x128xbf16>
    %cst_11 = arith.constant dense<0.000000e+00> : vector<8x128xf32>
    %28 = tpu.matmul %26, %27, %cst_11 {dimension_numbers = #tpu.dot_dimension_numbers<[1], [0], [0], [1], [0, 0, 1, 1], [], []>} : vector<8x128xbf16>, vector<128x128xbf16>, vector<8x128xf32> -> vector<8x128xf32>
    %c0_12 = arith.constant 0 : index
    %c0_13 = arith.constant 0 : index
    %29 = vector.load %arg6[%c0_12, %c0_13] : memref<1x128xf32, #tpu.memory_space<vmem>>, vector<1x128xf32>
    %30 = vector.broadcast %29 : vector<1x128xf32> to vector<8x128xf32>
    %31 = arith.addf %28, %30 : vector<8x128xf32>
    %c0_i32_14 = arith.constant 0 : i32
    %c8_i32_15 = arith.constant 8 : i32
    %32 = arith.addi %c0_i32_14, %c8_i32_15 : i32
    %c1_i32_16 = arith.constant 1 : i32
    scf.for %arg11 = %c0_i32_14 to %32 step %c1_i32_16  : i32 {
      %c1_i32_22 = arith.constant 1 : i32
      %36 = arith.muli %arg11, %c1_i32_22 : i32
      %c0_i32_23 = arith.constant 0 : i32
      %37 = arith.addi %c0_i32_23, %36 : i32
      %c0_i32_24 = arith.constant 0 : i32
      %c0_i32_25 = arith.constant 0 : i32
      %38 = tpu.memref_slice %arg7[%c0_i32_24, %c0_i32_25] : memref<11x128xf32, #tpu.memory_space<any>> -> memref<1x128xf32, #tpu.memory_space<any>>
      %c0_i32_26 = arith.constant 0 : i32
      %39 = tpu.memref_slice %arg9[%37, %c0_i32_26] : memref<8x128xf32, #tpu.memory_space<vmem>> -> memref<1x128xf32, #tpu.memory_space<vmem>>
      tpu.wait_dma2 semaphore(%arg10 : memref<!tpu.dma_semaphore, #tpu.memory_space<semaphore_mem>>) src(%38 : memref<1x128xf32, #tpu.memory_space<any>>) dst(%39 : memref<1x128xf32, #tpu.memory_space<vmem>>)
    }
    %c8_i32_17 = arith.constant 8 : i32
    %c0_18 = arith.constant 0 : index
    %c0_19 = arith.constant 0 : index
    %33 = vector.load %arg9[%c0_18, %c0_19] : memref<8x128xf32, #tpu.memory_space<vmem>>, vector<8x128xf32>
    %34 = arith.addf %31, %33 : vector<8x128xf32>
    %c0_20 = arith.constant 0 : index
    %c0_21 = arith.constant 0 : index
    %35 = vector.load %arg8[%c0_20, %c0_21] : memref<8x128xf32, #tpu.memory_space<vmem>>, vector<8x128xf32>
    tpu.vector_store %arg8[%c0_20, %c0_21], %34 {strides = array<i32>} : memref<8x128xf32, #tpu.memory_space<vmem>>, vector<8x128xf32>,
    return
  }
  func.func @transform_0(%arg0: i32) -> (i32, i32) {
    %c0_i32 = arith.constant 0 : i32
    %c0_i32_0 = arith.constant 0 : i32
    return %arg0, %c0_i32 : i32, i32
  }
  func.func @transform_1(%arg0: i32) -> i32 {
    %c0_i32 = arith.constant 0 : i32
    %c0_i32_0 = arith.constant 0 : i32
    return %c0_i32 : i32
  }
  func.func @transform_2(%arg0: i32) -> (i32, i32) {
    %c0_i32 = arith.constant 0 : i32
    %c0_i32_0 = arith.constant 0 : i32
    %c0_i32_1 = arith.constant 0 : i32
    return %c0_i32, %c0_i32_0 : i32, i32
  }
  func.func @transform_3(%arg0: i32) -> (i32, i32) {
    %c0_i32 = arith.constant 0 : i32
    %c0_i32_0 = arith.constant 0 : i32
    %c0_i32_1 = arith.constant 0 : i32
    return %c0_i32, %c0_i32_0 : i32, i32
  }
  func.func @transform_4(%arg0: i32) -> (i32, i32) {
    %c0_i32 = arith.constant 0 : i32
    %c0_i32_0 = arith.constant 0 : i32
    %c0_i32_1 = arith.constant 0 : i32
    return %c0_i32, %c0_i32_0 : i32, i32
  }
  func.func @transform_5(%arg0: i32) -> (i32, i32) {
    %c0_i32 = arith.constant 0 : i32
    %c0_i32_0 = arith.constant 0 : i32
    %c0_i32_1 = arith.constant 0 : i32
    return %c0_i32, %c0_i32_0 : i32, i32
  }
  func.func @transform_7(%arg0: i32) -> (i32, i32) {
    %c0_i32 = arith.constant 0 : i32
    %c0_i32_0 = arith.constant 0 : i32
    return %arg0, %c0_i32 : i32, i32
  }
}

</mosaic_0001>

<bundles_post_ra>
// kernel: tpu_custom_call.1
= control target key start
LH: loop header
LB: loop body
LE: loop exit
PB: predicated region body
PF: predicated region fallthrough
CT: control target
= control target key end

     0   :  { %12 = vsyncpa [#allocation7], 0  ;;  %s1094_s0 = inlined_call_operand.vmem [shape: f32[8,1], index: 0, kind: input, shape index: {}]   ;;  %s1095_s1 = inlined_call_operand.vmem [shape: s32[8], index: 1, kind: input, shape index: {}]   ;;  %s1096_s2 = inlined_call_operand.hbm [shape: bf16[256,128], index: 2, kind: input, shape index: {}]   ;;  %s1097_s3 = inlined_call_operand.vmem [shape: f32[1,128], index: 3, kind: input, shape index: {}]   ;;  %s1098_s4 = inlined_call_operand.hbm [shape: bf16[128,128], index: 4, kind: input, shape index: {}]   ;;  %s1099_s5 = inlined_call_operand.vmem [shape: f32[1,128], index: 5, kind: input, shape index: {}]   ;;  %s1100_s6 = inlined_call_operand.vmem [shape: f32[11,128], index: 6, kind: input, shape index: {}]   ;;  %s1101_s7 = inlined_call_operand.hbm [shape: f32[8,128], index: 7, kind: output, shape index: {}]  }
   0x1   :  { %13 = vsyncpa [#allocation5], 0 }
   0x2   :  { %14 = vsyncpa [#allocation10], 0 }
   0x3   :  { %15 = vsyncpa [#allocation6], 0  ;;  %s24_s26 = sshll.u32 %s1095_s1, 4  ;;  %s25_s26 = int_to_ptr.vmem [resolvable:$true] %s24_s26 }
   0x4   :  { %s863_s27 = scalar_lea.vmem %s25_s26, 16  ;;  %p868_p1 = scmp.lt.s32.totalorder %s25_s26, %s25_s26 }
   0x5   :  { %p864_p0 = scmp.ne.s32.totalorder %s25_s26, %s863_s27  ;;  %p869_p2 = scmp.lt.s32.totalorder %s863_s27, %s863_s27 }
   0x7   :  { %p870_p3 = por %p869_p2, %p868_p1 }
   0x9   :  { %p871_p4 = pnand %p870_p3, %p864_p0 }
   0xb   :  { %874 = shalt.err (!%p871_p4)
}
   0xc   :  { %s967_s28 = smov [#allocation4]   ;;  %s968_s29 = smov [#allocation8]  }
   0xd   :  { %27 = dma.vmem_to_smem %s25_s26, 16, %s967_s28, [#allocation7]  }
   0xe   :  { %s33_s30 = sshll.u32 %s968_s29, 4  ;;  %s875_s10 = scalar_lea.hbm %s1096_s2, 2048  ;;  %s34_s30 = int_to_ptr.vmem [resolvable:$true] %s33_s30 }
   0xf   :  { %p876_p5 = scmp.ne.s32.totalorder %s1096_s2, %s875_s10  ;;  %p879_p6 = scmp.lt.u32.totalorder %s875_s10, %s1096_s2 }
  0x11   :  { %p881_p7 = pnand %p879_p6, %p876_p5 }
  0x13   :  { %884 = shalt.err (!%p881_p7)
}
  0x14   :  { %s885_s14 = scalar_lea.vmem %s34_s30, 2048  ;;  %p890_p9 = scmp.lt.s32.totalorder %s34_s30, %s34_s30 }
  0x15   :  { %p886_p8 = scmp.ne.s32.totalorder %s34_s30, %s885_s14  ;;  %p891_p10 = scmp.lt.s32.totalorder %s885_s14, %s885_s14 }
  0x17   :  { %p892_p11 = por %p891_p10, %p890_p9 }
  0x19   :  { %p893_p12 = pnand %p892_p11, %p886_p8 }
  0x1b   :  { %896 = shalt.err (!%p893_p12)
}
  0x1c   :  { %s969_s15 = smov 64   ;;  %s970_s16 = smov 4  }
  0x1d   :  { %39 = dma.hbm_to_vmem [thread:$0]  %s1096_s2, 2048, %s34_s30, [#allocation5], %s969_s15, %s969_s15, %s970_s16  }
  0x1e   :  { %s971_s19 = smov [#allocation9]   ;;  %s897_s23 = scalar_lea.hbm %s1098_s4, 1024 }
  0x1f   :  { %s47_s20 = sshll.u32 %s971_s19, 4  ;;  %p898_p13 = scmp.ne.s32.totalorder %s1098_s4, %s897_s23  ;;  %s48_s20 = int_to_ptr.vmem [resolvable:$true] %s47_s20 }
  0x20   :  { %p901_p0 = scmp.lt.u32.totalorder %s897_s23, %s1098_s4 }
  0x22   :  { %p903_p1 = pnand %p901_p0, %p898_p13 }
  0x24   :  { %906 = shalt.err (!%p903_p1)
}
  0x25   :  { %s907_s28 = scalar_lea.vmem %s48_s20, 1024  ;;  %p912_p3 = scmp.lt.s32.totalorder %s48_s20, %s48_s20 }
  0x26   :  { %p908_p2 = scmp.ne.s32.totalorder %s48_s20, %s907_s28  ;;  %p913_p4 = scmp.lt.s32.totalorder %s907_s28, %s907_s28 }
  0x28   :  { %p914_p5 = por %p913_p4, %p912_p3 }
  0x2a   :  { %p915_p6 = pnand %p914_p5, %p908_p2 }
  0x2c   :  { %918 = shalt.err (!%p915_p6)
}
  0x2d   :  { %53 = dma.hbm_to_vmem [thread:$0]  %s1098_s4, 1024, %s48_s20, [#allocation10], %s969_s15, %s969_s15, %s970_s16  }
  0x2e   :  { %949 = dma.done.wait [#allocation7], 16  }
  0x2f   :  { %950 = vsyncadd [#allocation7], 4294967280 }
  0x30   :  { %951 = dma.done.wait [#allocation5], 2048  }
  0x31   :  { %952 = vsyncadd [#allocation5], 4294965248 }
  0x32   :  { %953 = dma.done.wait [#allocation10], 1024  }
  0x33   :  { %954 = vsyncadd [#allocation10], 4294966272 }
  0x34   :  { %65 = sfence }
  0x35   :  { %s959_s30 = smov 0  }
  0x36 LB: > { %s75_s8 = sld [smem:[#allocation4 + %s961_s30]]  ;;  %s81_s11 = scalar_lea.vmem [#allocation2], %s961_s30  ;;  %s961_s30 = sphi %s959_s30, %s73_s30  }
  0x3c   : > { %p76_p7 = scmp.gt.s32.totalorder %s75_s8, 0  ;;  %p699_p8 = scmp.lt.s32.totalorder %s75_s8, 10 }
  0x3e   : > { %s1103_s8 = smov (!%p76_p7, %s75_s8), 0 }
  0x3f   : > { %s1105_s8 = smov (!%p699_p8, %s1103_s8), 10 }
  0x40   : > { %s80_s4 = scalar_lea.vmem %s1100_s6, %s1105_s8 }
  0x41   : > { %v99_v0 = vld [vmem:[%s80_s4] sm:$0x1] }
  0x42   : > { %100 = vst [vmem:[%s81_s11] sm:$0x1] %v99_v0 }
  0x43   : > { %125 = vsyncadd [#allocation3], 16  ;;  %s73_s30 = sadd.s32 1, %s961_s30  }
  0x44   : > { %p70_p9 = scmp.ge.s32.totalorder %s73_s30, 8  }
  0x45   :  { %v126_v1 = vld [vmem:[%s1094_s0] sm:$0xff] (%p70_p9)  ;;  %v972_v2 = vmov (%p70_p9), 0   ;;  %v829_v3 = vld [vmem:[#allocation8 + $0x40] sm:$0xff] (%p70_p9)   ;;  %v833_v7 = vld [vmem:[#allocation8 + $0x50] sm:$0xff] (%p70_p9)   ;;  %v127_v19 = vlaneseq (%p70_p9)  ;;  %v973_v38 = vmov (%p70_p9), 2102212464  }
  0x46   :  { %72 = sbr.rel (!%p70_p9) target bundleno = 54 (0x36), region = 112  ;;  %828 = vset.pattern.permute.xlu0 (%p70_p9), %v972_v2  ;;  %v830_v4 = vld [vmem:[#allocation8] sm:$0xff] (%p70_p9)   ;;  %v831_v5 = vld [vmem:[#allocation8 + $0x48] sm:$0xff] (%p70_p9)   ;;  %742 = vmatprep.subr.bf16.mxu0 (%p70_p9), %v829_v3  ;;  %v834_v8 = vld [vmem:[#allocation8 + $0x10] sm:$0xff] (%p70_p9)   ;;  %v974_v40 = vmov (%p70_p9), 920167782  }
  0x47   :  { %135 = vperm.xlu0 (%p70_p9), %828, %v126_v1   ;;  %743 = vmatpush3.bf16.msra.mxu0 (%p70_p9), %v830_v4  ;;  %v832_v6 = vld [vmem:[#allocation8 + $0x8] sm:$0xff] (%p70_p9)   ;;  %v835_v9 = vld [vmem:[#allocation8 + $0x58] sm:$0xff] (%p70_p9)   ;;  %v837_v11 = vld [vmem:[#allocation8 + $0x60] sm:$0xff] (%p70_p9)   ;;  %v128_v20 = vand.u32 (%p70_p9), 127, %v127_v19  ;;  %v975_v44 = vmov (%p70_p9), 1326507024  }
  0x48   :  { %744 = vmatprep.subr.bf16.mxu0 (%p70_p9), %v831_v5  ;;  %v836_v10 = vld [vmem:[#allocation8 + $0x18] sm:$0xff] (%p70_p9)   ;;  %v838_v12 = vld [vmem:[#allocation8 + $0x20] sm:$0xff] (%p70_p9)   ;;  %v839_v13 = vld [vmem:[#allocation8 + $0x68] sm:$0xff] (%p70_p9)   ;;  %v976_v46 = vmov (%p70_p9), 683565275  }
  0x49   :  { %v840_v14 = vld [vmem:[#allocation8 + $0x28] sm:$0xff] (%p70_p9)   ;;  %v841_v15 = vld [vmem:[#allocation8 + $0x70] sm:$0xff] (%p70_p9)   ;;  %v843_v17 = vld [vmem:[#allocation8 + $0x78] sm:$0xff] (%p70_p9)   ;;  %v129_v21 = vcvt.s32.f32 (%p70_p9), %v128_v20  ;;  %v977_v48 = vmov (%p70_p9), 2475754826  }
  0x4a   :  { %v842_v16 = vld [vmem:[#allocation8 + $0x30] sm:$0xff] (%p70_p9)   ;;  %v844_v18 = vld [vmem:[#allocation8 + $0x38] sm:$0xff] (%p70_p9)   ;;  %v978_v51 = vmov (%p70_p9), 2131351028  }
  0x4b   :  { %745 = vmatpush3.bf16.msra.mxu0 (%p70_p9), %v832_v6  ;;  %v130_v22 = vmul.f32 (%p70_p9), -0.072522365, %v129_v21 }
  0x4c   :  { %746 = vmatprep.subr.bf16.mxu0 (%p70_p9), %v833_v7 }
  0x4d   :  { %v131_v23 = vmul.f32 1.442695, %v130_v22 }
  0x4f   :  { %747 = vmatpush3.bf16.msra.mxu0 %v834_v8  ;;  %853 = vpow2.f32 %v131_v23 }
  0x50   :  { %748 = vmatprep.subr.bf16.mxu0 %v835_v9 }
  0x53   :  { %749 = vmatpush3.bf16.msra.mxu0 %v836_v10 }
  0x54   :  { %750 = vmatprep.subr.bf16.mxu0 %v837_v11 }
  0x57   :  { %751 = vmatpush3.bf16.msra.mxu0 %v838_v12 }
  0x58   :  { %752 = vmatprep.subr.bf16.mxu0 %v839_v13 }
  0x59   :  { %v854_v24 = vpop.eup %853 }
  0x5b   :  { %753 = vmatpush3.bf16.msra.mxu0 %v840_v14 }
  0x5c   :  { %754 = vmatprep.subr.bf16.mxu0 %v841_v15 }
  0x5f   :  { %755 = vmatpush3.bf16.msra.mxu0 %v842_v16 }
  0x60   :  { %756 = vmatprep.subr.bf16.mxu0 %v843_v17 }
  0x63   :  { %757 = vmatpush3.bf16.msra.mxu0 %v844_v18 }
  0xc6   :  { %v136_v25 = vpop.permute.xlu0 %135 }
  0xc7   :  { %v1055_v26 = vmul.f32 %v854_v24, %v136_v25 }
  0xc9   :  { %v142_v27 = vand.u32 2139095040, %v1055_v26  ;;  %v139_v28 = vand.u32 2147483647, %v1055_v26  ;;  %vm141_vm7 = vcmp.lt.s32.totalorder %v1055_v26, 0  ;;  %vm231_vm15 = vweird.f32 %v1055_v26 }
  0xcb   :  { %v143_v29 = vshrl.u32 %v142_v27, 23  ;;  %v146_v31 = vand.u32 8388607, %v139_v28  ;;  %vm140_vm8 = vcmp.le.f32.partialorder %v139_v28, 0.7853982 }
  0xcd   :  { %v704_v30 = vadd.s32 4294967169, %v143_v29  ;;  %v147_v34 = vor.u32 8388608, %v146_v31 }
  0xcf   :  { %v149_v32 = vadd.s32 1, %v704_v30  ;;  %v187_v42 = vshll.u32 %v147_v34, 8 }
  0xd1   :  { %vm150_vm0 = vcmp.gt.s32.totalorder %v149_v32, 0 }
  0xd2   :  { %v151_v33 = vsel %vm150_vm0, %v149_v32, 0  ;;  %vm980_vm0 = vmmov 0  }
  0xd3   :  { %v153_v35 = vand.u32 31, %v151_v33  ;;  %v152_v36 = vshrl.u32 %v151_v33, 5 }
  0xd5   :  { %v154_v37 = vsub.s32 32, %v153_v35  ;;  %v165_v39 = vshll.u32 %v973_v38, %v153_v35  ;;  %v168_v41 = vshll.u32 %v974_v40, %v153_v35  ;;  %v156_v47 = vshll.u32 %v976_v46, %v153_v35 }
  0xd6   :  { %v159_v50 = vshll.u32 %v977_v48, %v153_v35  ;;  %v162_v53 = vshll.u32 %v978_v51, %v153_v35  ;;  %vm174_vm1 = vcmp.lt.s32.totalorder %v152_v36, 4  ;;  %vm171_vm2 = vcmp.lt.s32.totalorder %v152_v36, 1 }
  0xd7   :  { %v166_v43 = vshrl.u32 %v974_v40, %v154_v37  ;;  %v169_v45 = vshrl.u32 %v975_v44, %v154_v37  ;;  %v157_v49 = vshrl.u32 %v977_v48, %v154_v37  ;;  %v160_v52 = vshrl.u32 %v978_v51, %v154_v37 }
  0xd8   :  { %v163_v54 = vshrl.u32 %v973_v38, %v154_v37  ;;  %v155_v58 = vshrl.u32 %v976_v46, %v154_v37  ;;  %vm172_vm3 = vcmp.lt.s32.totalorder %v152_v36, 2  ;;  %vm173_vm4 = vcmp.lt.s32.totalorder %v152_v36, 3 }
  0xd9   :  { %v167_v55 = vor.u32 %v166_v43, %v165_v39  ;;  %v170_v56 = vor.u32 %v169_v45, %v168_v41  ;;  %v158_v57 = vor.u32 %v157_v49, %v156_v47  ;;  %v161_v59 = vor.u32 %v160_v52, %v159_v50 }
  0xda   :  { %v164_v60 = vor.u32 %v163_v54, %v162_v53 }
  0xdb   :  { %v180_v61 = vsel %vm174_vm1, %v167_v55, 920167782  ;;  %v184_v62 = vsel %vm174_vm1, %v170_v56, 1326507024  ;;  %v179_v0 = vsel %vm171_vm2, %v158_v57, %v161_v59  ;;  %v175_v3 = vsel %vm171_vm2, %v155_v58, %v158_v57 }
  0xdc   :  { %v176_v63 = vsel %vm174_vm1, %v164_v60, 2102212464  ;;  %v181_v1 = vsel %vm173_vm4, %v164_v60, %v180_v61  ;;  %v183_v2 = vsel %vm171_vm2, %v161_v59, %v164_v60  ;;  %v185_v6 = vsel %vm173_vm4, %v167_v55, %v184_v62  ;;  %v845_v62 = vld [vmem:[#allocation9] sm:$0xff]  }
  0xdd   :  { %v177_v4 = vsel %vm173_vm4, %v161_v59, %v176_v63  ;;  %v182_v5 = vsel %vm172_vm3, %v179_v0, %v181_v1  ;;  %v186_v7 = vsel %vm172_vm3, %v183_v2, %v185_v6  ;;  %v979_v63 = vmov 0.0   ;;  %v846_v0 = vld [vmem:[#allocation9 + $0x8] sm:$0xff]   ;;  %v847_v1 = vld [vmem:[#allocation9 + $0x10] sm:$0xff]   ;;  %v849_v2 = vld [vmem:[#allocation9 + $0x20] sm:$0xff]  }
  0xde   :  { %v1061_v8 = vmul.u32.u64.low %v187_v42, %v182_v5  ;;  %v1062_v9 = vmul.u32.u64.high %v187_v42, %v182_v5, %v1061_v8  ;;  %v1064_v10 = vmul.u32.u64.low %v187_v42, %v186_v7  ;;  %v1065_v11 = vmul.u32.u64.high %v187_v42, %v186_v7, %v1064_v10  ;;  %773 = vmatprep.subr.bf16.mxu1 %v979_v63  ;;  %789 = vmatprep.mubr.msk.bf16.mxu1 %vm980_vm0, %v979_v63  ;;  %v852_v5 = vld [vmem:[#allocation9 + $0x38] sm:$0xff]   ;;  %v712_v7 = vld [vmem:[%s1097_s3] ss:$0 sm:$0xff]  ;;  %s963_s3 = smov 0  }
  0xdf   :  { %v178_v12 = vsel %vm172_vm3, %v175_v3, %v177_v4  ;;  %774 = vmatpush3.bf16.msra.mxu1 %v845_v62  ;;  %v850_v3 = vld [vmem:[#allocation9 + $0x28] sm:$0xff]   ;;  %v851_v4 = vld [vmem:[#allocation9 + $0x30] sm:$0xff]  }
  0xe0   :  { %v197_v13 = vadd.s32 1, %v1062_v9  ;;  %v194_v14 = vmul.u32 %v187_v42, %v178_v12  ;;  %vm196_vm5 = vc.u32 %v1065_v11, %v1061_v8  ;;  %v195_v27 = vadd.s32 %v1061_v8, %v1065_v11  ;;  %775 = vmatprep.subr.bf16.mxu1 %v979_v63 }
  0xe2   :  { %v198_v15 = vsel %vm196_vm5, %v197_v13, %v1062_v9 }
  0xe3   :  { %v199_v16 = vadd.s32 %v198_v15, %v194_v14  ;;  %776 = vmatpush3.bf16.msra.mxu1 %v846_v0 }
  0xe4   :  { %777 = vmatprep.subr.bf16.mxu1 %v979_v63 }
  0xe5   :  { %v200_v17 = vadd.s32 536870912, %v199_v16 }
  0xe7   :  { %v201_v18 = vshrl.u32 %v200_v17, 30  ;;  %778 = vmatpush3.bf16.msra.mxu1 %v847_v1 }
  0xe8   :  { %779 = vmatprep.subr.bf16.mxu1 %v979_v63 }
  0xe9   :  { %v202_v19 = vshll.u32 %v201_v18, 30  ;;  %v225_v40 = vsub.s32 4, %v201_v18 }
  0xeb   :  { %v203_v20 = vsub.s32 %v199_v16, %v202_v19  ;;  %v226_v43 = vsel %vm141_vm7, %v225_v40, %v201_v18  ;;  %v730_v19 = vld [vmem:[%s1099_s5] ss:$0 sm:$0xff] }
  0xec   :  { %v228_v45 = vsel %vm140_vm8, 0, %v226_v43 }
  0xed   :  { %v205_v21 = vsub.s32 0, %v203_v20  ;;  %v335_v46 = vadd.s32 3, %v228_v45  ;;  %v232_v47 = vand.u32 3, %v228_v45 }
  0xef   :  { %v705_v22 = vmin.u32 %v205_v21, %v203_v20  ;;  %v336_v48 = vand.u32 3, %v335_v46  ;;  %vm237_vm9 = vcmp.eq.s32.totalorder %v232_v47, 2  ;;  %vm234_vm11 = vcmp.eq.s32.totalorder %v232_v47, 0 }
  0xf0   :  { %vm233_vm13 = vcmp.lt.s32.totalorder %v232_v47, 2 }
  0xf1   :  { %v207_v23 = vclz %v705_v22  ;;  %vm341_vm10 = vcmp.eq.s32.totalorder %v336_v48, 2  ;;  %vm338_vm12 = vcmp.eq.s32.totalorder %v336_v48, 0  ;;  %vm337_vm14 = vcmp.lt.s32.totalorder %v336_v48, 2 }
  0xf3   :  { %v706_v24 = vadd.s32 4294967294, %v207_v23 }
  0xf5   :  { %vm707_vm6 = vcmp.lt.s32.totalorder %v706_v24, 0 }
  0xf6   :  { %v210_v25 = vsel %vm707_vm6, 0, %v706_v24 }
  0xf7   :  { %v211_v29 = vsub.s32 32, %v210_v25  ;;  %v215_v30 = vsub.s32 4294967266, %v210_v25  ;;  %v212_v31 = vshll.u32 %v203_v20, %v210_v25 }
  0xf9   :  { %v213_v32 = vshrl.u32 %v195_v27, %v211_v29  ;;  %v216_v33 = vadd.s32 127, %v215_v30 }
  0xfb   :  { %v214_v34 = vor.u32 %v213_v32, %v212_v31  ;;  %v217_v35 = vshll.u32 %v216_v33, 23 }
  0xfd   :  { %v218_v36 = vor.u32 4788187, %v217_v35  ;;  %v221_v38 = vcvt.s32.f32 %v214_v34 }
  0xff   :  { %v219_v37 = vand.u32 2147483647, %v218_v36 }
 0x101   :  { %v222_v39 = vmul.f32 %v221_v38, %v219_v37 }
 0x103   :  { %v223_v41 = vxor.u32 2147483648, %v222_v39 }
 0x105   :  { %v224_v42 = vsel %vm141_vm7, %v223_v41, %v222_v39 }
 0x106   :  { %v227_v44 = vsel %vm140_vm8, %v1055_v26, %v224_v42  ;;  %v848_v26 = vld [vmem:[#allocation9 + $0x18] sm:$0xff]  }
 0x107   :  { %855 = vcosq.f32 %v227_v44  ;;  %780 = vmatpush3.bf16.msra.mxu1 %v848_v26 }
 0x108   :  { %857 = vsinq.f32 %v227_v44  ;;  %781 = vmatprep.subr.bf16.mxu1 %v979_v63 }
 0x10b   :  { %782 = vmatpush3.bf16.msra.mxu1 %v849_v2 }
 0x10c   :  { %783 = vmatprep.subr.bf16.mxu1 %v979_v63 }
 0x10f   :  { %784 = vmatpush3.bf16.msra.mxu1 %v850_v3 }
 0x110   :  { %785 = vmatprep.subr.bf16.mxu1 %v979_v63 }
 0x111   :  { %v856_v49 = vpop.eup %855 }
 0x112   :  { %v858_v50 = vpop.eup %857  ;;  %v238_v51 = vxor.u32 2147483648, %v856_v49 }
 0x113   :  { %v235_v52 = vxor.u32 2147483648, %v858_v50  ;;  %786 = vmatpush3.bf16.msra.mxu1 %v851_v4 }
 0x114   :  { %v239_v53 = vsel %vm237_vm9, %v238_v51, %v858_v50  ;;  %v343_v28 = vsel %vm341_vm10, %v238_v51, %v858_v50  ;;  %787 = vmatprep.subr.bf16.mxu1 %v979_v63 }
 0x115   :  { %v236_v54 = vsel %vm234_vm11, %v856_v49, %v235_v52  ;;  %v340_v55 = vsel %vm338_vm12, %v856_v49, %v235_v52 }
 0x116   :  { %v240_v56 = vsel %vm233_vm13, %v236_v54, %v239_v53  ;;  %v344_v57 = vsel %vm337_vm14, %v340_v55, %v343_v28 }
 0x117   :  { %v241_v58 = vsel %vm231_vm15, nan, %v240_v56  ;;  %v345_v59 = vsel %vm231_vm15, nan, %v344_v57  ;;  %788 = vmatpush3.bf16.msra.mxu1 %v852_v5 }
 0x118   :  { %v346_v60 = vpack.c.bf16 %v241_v58, %v241_v58  ;;  %v347_v61 = vpack.c.bf16 %v345_v59, %v345_v59 }
 0x11a   :  { %515 = vmatprep.mubr.bf16.mxu0 %v347_v61 }
 0x11b   :  { %516 = vmatmul.mubr.bf16.vlgmr.msra.gmra.mrb[0].mxu0 %v346_v60 }
 0x1ee   :  { %v758_v6 = vpop.f32.mrb[0].mxu0 }
 0x1ef   :  { %v759_v8 = vpop.f32.mrb[1].mxu0 }
 0x1f0   :  { %v760_v9 = vadd.f32 %v759_v8, %v758_v6  ;;  %v761_v10 = vpop.f32.mrb[2].mxu0 }
 0x1f1   :  { %v762_v11 = vpop.f32.mrb[3].mxu0 }
 0x1f2   :  { %v518_v12 = vadd.f32 %v760_v9, %v712_v7 }
 0x1f4   :  { %v729_v13 = vmul.f32 -1.442695, %v518_v12 }
 0x1f6   :  { %859 = vpow2.f32 %v729_v13 }
 0x200   :  { %v860_v14 = vpop.eup %859 }
 0x201   :  { %v526_v15 = vadd.f32 1.0, %v860_v14 }
 0x203   :  { %861 = vrcp.f32 %v526_v15 }
 0x20d   :  { %v862_v16 = vpop.eup %861 }
 0x20e   :  { %v529_v17 = vmul.f32 %v862_v16, %v518_v12 }
 0x210   :  { %v530_v18 = vpack.c.bf16 %v529_v17, %v529_v17 }
 0x212   :  { %790 = vmatmul.mubr.bf16.vlgmr.msra.gmra.mrb[0].mxu1 %v530_v18 }
 0x2e5   :  { %v636_v20 = vpop.f32.mrb[0].mxu1 }
 0x2e6   :  { %v637_v21 = vadd.f32 %v730_v19, %v636_v20  ;;  %v791_v22 = vpop.f32.mrb[1].mxu1 }
 0x2e7   :  { %v639_v23 = vpop.f32.mrb[2].mxu1 }
 0x2e8   :  { %v792_v24 = vpop.f32.mrb[3].mxu1 }
 0x2e9 LB: > { %955 = dma.done.wait [#allocation3], 16  ;;  %s965_s3 = sphi %s963_s3, %s647_s3  }
 0x2ea   : > { %956 = vsyncadd [#allocation3], 4294967280  ;;  %s647_s3 = sadd.s32 1, %s965_s3  }
 0x2eb   : > { %p644_p10 = scmp.ge.s32.totalorder %s647_s3, 8  }
 0x2ec   :  { %v651_v25 = vld [vmem:[#allocation2] sm:$0xff] (%p644_p10)  ;;  %s981_s15 = smov (%p644_p10), [#allocation11]  }
 0x2ed   :  { %646 = sbr.rel (!%p644_p10) target bundleno = 745 (0x2e9), region = 123  ;;  %v652_v27 = vadd.f32 (%p644_p10), %v651_v25, %v637_v21  ;;  %s660_s16 = sshll.u32 (%p644_p10), %s981_s15, 4  ;;  %s661_s16 = int_to_ptr.vmem [resolvable:$true] %s660_s16 }
 0x2ee   :  { %s919_s5 = scalar_lea.vmem (%p644_p10), %s661_s16, 128  ;;  %p924_p12 = scmp.lt.s32.totalorder (%p644_p10), %s661_s16, %s661_s16 }
 0x2ef   :  { %653 = vst [vmem:[#allocation11] sm:$0xff] (%p644_p10), %v652_v27  ;;  %p920_p11 = scmp.ne.s32.totalorder (%p644_p10), %s661_s16, %s919_s5  ;;  %p925_p13 = scmp.lt.s32.totalorder (%p644_p10), %s919_s5, %s919_s5 }
 0x2f1   :  { %p926_p0 = por (%p644_p10), %p925_p13, %p924_p12 }
 0x2f3   :  { %p927_p1 = pnand (%p644_p10), %p926_p0, %p920_p11 }
 0x2f5   :  { %930 = shalt.err (!%p927_p1)
}
 0x2f6   :  { %s931_s19 = scalar_lea.hbm %s1101_s7, 128 }
 0x2f7   :  { %p932_p2 = scmp.ne.s32.totalorder %s1101_s7, %s931_s19  ;;  %p935_p3 = scmp.lt.u32.totalorder %s931_s19, %s1101_s7 }
 0x2f9   :  { %p937_p4 = pnand %p935_p3, %p932_p2 }
 0x2fb   :  { %940 = shalt.err (!%p937_p4)
}
 0x2fc   :  { %663 = dma.vmem_to_hbm [thread:$0]  %s661_s16, 128, %s1101_s7, [#allocation6]  }
 0x2fd   :  { %957 = dma.done.wait [#allocation6], 128  }
 0x2fe   :  { %958 = vsyncadd [#allocation6], 4294967168 }
 0x2ff   :  { %667 = vsyncpa [#allocation5], 1 }
 0x300   :  { %668 = vsyncpa [#allocation10], 1 }
 0x301   :  { %669 = vsyncpa [#allocation6], 1 }
 0x302   :  { %670 = vsyncpa [#allocation7], 1 }
 0x303   :  { %671 = vsyncmov [#allocation3] }
 0x306   :  { %s672_s26 = vpop.sfrf %671 }
 0x307   :  { %p739_p5 = scmp.ne.s32.totalorder %s672_s26, 0 }
 0x309   :  { %676 = shalt.err (%p739_p5)  }

</bundles_post_ra>
